<compile_context>
chip_gen: v6e
topology: v6e:2x2x1
jax: 0.10.0
libtpu: 0.0.40
codegen_flags: <defaults>
</compile_context>

<pallas_src>
import functools

import jax
import jax.numpy as jnp
from jax import lax
from jax.experimental import pallas as pl
from jax.experimental.pallas import tpu as pltpu


def _contrastive_loss_kernel(mm_ref, id_ref, out_ref, denom_ref, simsum_ref, *,
                             inv_temperature, batch_size, tile_q, tile_k,
                             needs_col_mask, needs_row_mask):
    qi = pl.program_id(0)          # query-panel index (parallel)
    ki = pl.program_id(1)          # key-tile index    (reduction)
    nk = pl.num_programs(1)

    inv_t = jnp.float32(inv_temperature)

    # --- first key tile for this panel: zero the per-row accumulators.
    @pl.when(ki == 0)
    def _init():
        denom_ref[...] = jnp.zeros_like(denom_ref)
        simsum_ref[...] = jnp.zeros_like(simsum_ref)

    # Cosine similarities on the MXU: both operands are pre-normalized and
    # already in the MXU dtype; contract dim 1 of both (no transpose), f32 acc.
    sim = lax.dot_general(
        mm_ref[...], id_ref[...],
        dimension_numbers=(((1,), (1,)), ((), ())),
        preferred_element_type=jnp.float32)                       # (TQ, TK) f32

    # Global row / column ids of this tile (diagonal + padding masks).
    row_g = qi * tile_q + lax.broadcasted_iota(jnp.int32, (tile_q, tile_k), 0)
    col_g = ki * tile_k + lax.broadcasted_iota(jnp.int32, (tile_q, tile_k), 1)

    # Numerator log-sum: padded columns are zero vectors -> sim is exactly 0
    # there, so no column mask is needed for this sum.
    simsum_ref[...] += jnp.sum(sim, axis=-1, keepdims=True)

    # Shifted denominator: exclude the diagonal (and padded columns) straight
    # from the sim tile so the exclusion is exact irrespective of MXU dtype.
    e = jnp.exp((sim - 1.0) * inv_t)                              # EUP, <= ~1
    keep = row_g != col_g
    if needs_col_mask:
        keep = jnp.logical_and(keep, col_g < batch_size)
    denom_ref[...] += jnp.sum(jnp.where(keep, e, 0.0), axis=-1, keepdims=True)

    # --- last key tile: finalize the per-row contribution for this panel.
    @pl.when(ki == nk - 1)
    def _finalize():
        # sum_j log(num_ij/denom_i) = (1/T)*sum_j sim_ij - B*log(denom_i),
        # with log(denom_i) = 1/T + log(shifted_denom_i).
        per_row = (inv_t * simsum_ref[...]
                   - jnp.float32(batch_size)
                   * (inv_t + jnp.log(denom_ref[...])))
        if needs_row_mask:
            per_row = jnp.where(row_g[:, :1] < batch_size, per_row, 0.0)
        out_ref[...] = per_row                                     # (TQ, 1)


def _round_up(x, m):
    return -(-x // m) * m


def _vmem_budget_bytes():
    """Generation-aware VMEM budget: ~75% of per-core capacity.
    (~96 MiB on v5e/v6e's 128 MiB, ~48 MiB on v7x's 64 MiB; safe fallback 48 MiB.)"""
    cap = 64 << 20
    try:
        info = pltpu.get_tpu_info()
        cap = int(getattr(info, "vmem_capacity_bytes", cap))
    except Exception:
        pass
    return min(int(cap * 3 // 4), 100 << 20)


def _choose_tiles(batch, feat, mxu_itemsize, budget):
    """Pick (tile_q, tile_k, padded_batch): lane-dense key tile, query panel as
    large as VMEM allows (<=1024 rows), keeping >=2 query panels when possible."""
    tile_k = 256 if batch > 128 else 128
    b_pad = _round_up(max(batch, 1), tile_k)
    nk = b_pad // tile_k

    def est_vmem(tq):
        return (2 * tq * feat * mxu_itemsize         # query panel (double-buffered)
                + 2 * tile_k * feat * mxu_itemsize   # key tile   (double-buffered)
                + 2 * tq * tile_k * 4                # sim / exp f32 tiles
                + 6 * tq * 128 * 4)                  # (tq,1) scratch + out, lane-padded

    best = tile_k
    for m in range(1, nk + 1):
        if nk % m:
            continue
        tq = m * tile_k
        if tq > 1024:
            break
        nq = nk // m
        if nq < 2 and nk >= 2:       # keep >=2 query panels (megacore / v7x 2 TCs)
            continue
        if est_vmem(tq) > budget:
            break
        best = tq
    return best, tile_k, b_pad


def contrastive_loss(mm, id_emb, temperature=0.07, precision="bfloat16",
                     tile_q=None, tile_k=None):
    """Pallas-TPU forward of ContrastiveLoss.

    precision: "bfloat16" (default — bf16 MXU operands, f32 accumulation) or
               "float32" (exact, multi-pass MXU).
    tile_q / tile_k: optional overrides (tile_q must be a multiple of tile_k).
    """
    assert mm.ndim == 2 and id_emb.shape == mm.shape
    B, D = mm.shape

    mxu_dtype = jnp.float32 if precision == "float32" else jnp.bfloat16
    mxu_isz = jnp.dtype(mxu_dtype).itemsize

    budget = _vmem_budget_bytes()
    if tile_q is None or tile_k is None:
        TQ, TK, B_pad = _choose_tiles(B, D, mxu_isz, budget)
    else:
        TQ, TK = int(tile_q), int(tile_k)
        assert TQ % TK == 0 and TK % 128 == 0
        B_pad = _round_up(B, TQ)
    nq, nk = B_pad // TQ, B_pad // TK

    # Normalize once in f32 (F.normalize semantics), zero-pad to the tile grid
    # (padded rows contribute exactly 0 to sim), cast to the MXU dtype.
    def _prep(x):
        x = x.astype(jnp.float32)
        n = jnp.sqrt(jnp.sum(x * x, axis=-1, keepdims=True))
        x = x / jnp.maximum(n, 1e-12)
        if B_pad != B:
            x = jnp.pad(x, ((0, B_pad - B), (0, 0)))
        return x.astype(mxu_dtype)

    mm_n = _prep(mm)
    id_n = _prep(id_emb)

    cost = pl.CostEstimate(
        flops=2 * B_pad * B_pad * D,
        transcendentals=B_pad * B_pad + B_pad,
        bytes_accessed=(nq + 1) * B_pad * D * mxu_isz + 4 * B_pad,
    )

    grid_spec = pltpu.PrefetchScalarGridSpec(
        num_scalar_prefetch=0,
        grid=(nq, nk),
        in_specs=[
            # Query panel: block index is constant over ki -> stays resident in
            # VMEM across the whole reduction (no re-DMA).
            pl.BlockSpec((TQ, D), lambda qi, ki: (qi, 0)),
            # Key tile: streamed over the reduction axis.
            pl.BlockSpec((TK, D), lambda qi, ki: (ki, 0)),
        ],
        out_specs=pl.BlockSpec((TQ, 1), lambda qi, ki: (qi, 0)),
        scratch_shapes=[
            pltpu.VMEM((TQ, 1), jnp.float32),   # running shifted denominator
            pltpu.VMEM((TQ, 1), jnp.float32),   # running sum of sim
        ],
    )

    per_row = pl.pallas_call(
        functools.partial(
            _contrastive_loss_kernel,
            inv_temperature=1.0 / float(temperature),
            batch_size=B, tile_q=TQ, tile_k=TK,
            needs_col_mask=(B_pad != B), needs_row_mask=(B_pad != B)),
        out_shape=jax.ShapeDtypeStruct((B_pad, 1), jnp.float32),
        grid_spec=grid_spec,
        compiler_params=pltpu.CompilerParams(
            dimension_semantics=("parallel", "arbitrary"),
            vmem_limit_bytes=budget),
        cost_estimate=cost,
    )(mm_n, id_n)

    # Tiny final reduction in the wrapper: loss = -mean over all B*B pairs.
    return -jnp.sum(per_row) / jnp.float32(B * B)


def _reference_loss(mm, id_emb, temperature=0.07):
    # Pure-JAX reference mirroring the PyTorch forward exactly (f32).
    mm = mm.astype(jnp.float32)
    id_emb = id_emb.astype(jnp.float32)
    eps = 1e-12
    mm_n = mm / jnp.maximum(jnp.linalg.norm(mm, axis=-1, keepdims=True), eps)
    id_n = id_emb / jnp.maximum(jnp.linalg.norm(id_emb, axis=-1, keepdims=True), eps)
    sim = mm_n @ id_n.T
    num = jnp.exp(sim / temperature)
    denom = num.sum(-1, keepdims=True) - jnp.diag(num)[:, None]
    return -jnp.mean(jnp.log(num / denom))


if __name__ == "__main__":
    key = jax.random.PRNGKey(0)
    k1, k2, k3, k4, k5, k6 = jax.random.split(key, 6)

    # Case 1: tiny module-spec shape (B=8, D=32), exact f32 MXU path.
    # Exercises batch padding (8 -> 128) and the row/col validity masks.
    mm = jax.random.normal(k1, (8, 32), dtype=jnp.float32)
    id_emb = jax.random.normal(k2, (8, 32), dtype=jnp.float32)
    loss = contrastive_loss(mm, id_emb, temperature=0.07, precision="float32")
    jax.block_until_ready(loss)
    ref = _reference_loss(mm, id_emb, temperature=0.07)
    assert jnp.allclose(loss, ref, rtol=5e-5, atol=1e-4), (loss, ref)

    # Case 2: non-divisible batch, default bf16 MXU path, auto tiling
    # (B=320 -> padded 512, TK=256, TQ=256 => 2x2 grid: key reduction + diag
    # correction inside non-diagonal-aligned tiles).
    mm2 = jax.random.normal(k3, (320, 64), dtype=jnp.float32)
    id2 = jax.random.normal(k4, (320, 64), dtype=jnp.float32)
    loss2 = contrastive_loss(mm2, id2, temperature=0.07)
    jax.block_until_ready(loss2)
    ref2 = _reference_loss(mm2, id2, temperature=0.07)
    assert jnp.allclose(loss2, ref2, rtol=2e-2, atol=5e-2), (loss2, ref2)

    # Case 3: rectangular TQ != TK override, exact f32 path, multi key tiles
    # (B=512, TQ=256, TK=128 => grid (2, 4)); verifies the overlap-mask diag.
    mm3 = jax.random.normal(k5, (512, 128), dtype=jnp.float32)
    id3 = jax.random.normal(k6, (512, 128), dtype=jnp.float32)
    loss3 = contrastive_loss(mm3, id3, temperature=0.07, precision="float32",
                             tile_q=256, tile_k=128)
    jax.block_until_ready(loss3)
    ref3 = _reference_loss(mm3, id3, temperature=0.07)
    assert jnp.allclose(loss3, ref3, rtol=5e-5, atol=1e-4), (loss3, ref3)

    print("KERNEL_OK")
</pallas_src>

<mosaic_0001>
module attributes {stable_mosaic.version = 11 : i64} {
  func.func @_contrastive_loss_kernel(%arg0: i32, %arg1: i32, %arg2: memref<128x32xf32, #tpu.memory_space<vmem>>, %arg3: memref<128x32xf32, #tpu.memory_space<vmem>>, %arg4: memref<128x1xf32, #tpu.memory_space<vmem>>, %arg5: memref<128x1xf32, #tpu.memory_space<vmem>>, %arg6: memref<128x1xf32, #tpu.memory_space<vmem>>) attributes {dimension_semantics = [#tpu.dimension_semantics<parallel>, #tpu.dimension_semantics<arbitrary>], iteration_bounds = array<i64: 1, 1>, scalar_prefetch = 0 : i64, scratch_operands = 2 : i64, tpu.core_type = #tpu.core_type<tc>, window_params = [{transform_indices = @transform_0, window_bounds = array<i64: 128, 32>}, {transform_indices = @transform_1, window_bounds = array<i64: 128, 32>}, {transform_indices = @transform_2, window_bounds = array<i64: 128, 1>}]} {
    %c0_i32 = arith.constant 0 : i32
    %0 = arith.cmpi eq, %arg1, %c0_i32 : i32
    %1 = arith.extui %0 : i1 to i32
    %c0_i32_0 = arith.constant 0 : i32
    %2 = arith.cmpi ne, %1, %c0_i32_0 : i32
    scf.if %2 {
      %cst_21 = arith.constant 0.000000e+00 : f32
      %38 = vector.broadcast %cst_21 : f32 to vector<128x1xf32>
      %c0_22 = arith.constant 0 : index
      %c0_23 = arith.constant 0 : index
      %39 = vector.load %arg5[%c0_22, %c0_23] : memref<128x1xf32, #tpu.memory_space<vmem>>, vector<128x1xf32>
      tpu.vector_store %arg5[%c0_22, %c0_23], %38 {strides = array<i32>} : memref<128x1xf32, #tpu.memory_space<vmem>>, vector<128x1xf32>,
      %cst_24 = arith.constant 0.000000e+00 : f32
      %40 = vector.broadcast %cst_24 : f32 to vector<128x1xf32>
      %c0_25 = arith.constant 0 : index
      %c0_26 = arith.constant 0 : index
      %41 = vector.load %arg6[%c0_25, %c0_26] : memref<128x1xf32, #tpu.memory_space<vmem>>, vector<128x1xf32>
      tpu.vector_store %arg6[%c0_25, %c0_26], %40 {strides = array<i32>} : memref<128x1xf32, #tpu.memory_space<vmem>>, vector<128x1xf32>,
    } else {
    }
    %c0 = arith.constant 0 : index
    %c0_1 = arith.constant 0 : index
    %3 = vector.load %arg2[%c0, %c0_1] : memref<128x32xf32, #tpu.memory_space<vmem>>, vector<128x32xf32>
    %c0_2 = arith.constant 0 : index
    %c0_3 = arith.constant 0 : index
    %4 = vector.load %arg3[%c0_2, %c0_3] : memref<128x32xf32, #tpu.memory_space<vmem>>, vector<128x32xf32>
    %cst = arith.constant dense<0.000000e+00> : vector<128x128xf32>
    %5 = tpu.matmul %3, %4, %cst {dimension_numbers = #tpu.dot_dimension_numbers<[1], [1], [0], [0], [0, 0, 1, 0], [], []>} : vector<128x32xf32>, vector<128x32xf32>, vector<128x128xf32> -> vector<128x128xf32>
    %c128_i32 = arith.constant 128 : i32
    %6 = arith.muli %arg0, %c128_i32 : i32
    %7 = tpu.iota {dimensions = array<i32: 0>} : vector<128x128xi32>
    %8 = vector.broadcast %6 : i32 to vector<128x128xi32>
    %9 = arith.addi %8, %7 : vector<128x128xi32>
    %c128_i32_4 = arith.constant 128 : i32
    %10 = arith.muli %arg1, %c128_i32_4 : i32
    %11 = tpu.iota {dimensions = array<i32: 1>} : vector<128x128xi32>
    %12 = vector.broadcast %10 : i32 to vector<128x128xi32>
    %13 = arith.addi %12, %11 : vector<128x128xi32>
    %c0_5 = arith.constant 0 : index
    %c0_6 = arith.constant 0 : index
    %14 = vector.load %arg6[%c0_5, %c0_6] : memref<128x1xf32, #tpu.memory_space<vmem>>, vector<128x1xf32>
    %cst_7 = arith.constant dense<0.000000e+00> : vector<128xf32>
    %15 = vector.multi_reduction <add>, %5, %cst_7 [1] : vector<128x128xf32> to vector<128xf32>
    %16 = vector.shape_cast %15 : vector<128xf32> to vector<128x1xf32>
    %17 = arith.addf %14, %16 : vector<128x1xf32>
    %c0_8 = arith.constant 0 : index
    %c0_9 = arith.constant 0 : index
    %18 = vector.load %arg6[%c0_8, %c0_9] : memref<128x1xf32, #tpu.memory_space<vmem>>, vector<128x1xf32>
    tpu.vector_store %arg6[%c0_8, %c0_9], %17 {strides = array<i32>} : memref<128x1xf32, #tpu.memory_space<vmem>>, vector<128x1xf32>,
    %cst_10 = arith.constant 1.000000e+00 : f32
    %19 = vector.broadcast %cst_10 : f32 to vector<128x128xf32>
    %20 = arith.subf %5, %19 : vector<128x128xf32>
    %cst_11 = arith.constant 14.2857141 : f32
    %21 = vector.broadcast %cst_11 : f32 to vector<128x128xf32>
    %22 = arith.mulf %20, %21 : vector<128x128xf32>
    %23 = math.exp %22 : vector<128x128xf32>
    %24 = arith.cmpi ne, %9, %13 : vector<128x128xi32>
    %c8_i32 = arith.constant 8 : i32
    %25 = vector.broadcast %c8_i32 : i32 to vector<128x128xi32>
    %26 = arith.cmpi slt, %13, %25 : vector<128x128xi32>
    %27 = arith.andi %24, %26 : vector<128x128xi1>
    %c0_12 = arith.constant 0 : index
    %c0_13 = arith.constant 0 : index
    %28 = vector.load %arg5[%c0_12, %c0_13] : memref<128x1xf32, #tpu.memory_space<vmem>>, vector<128x1xf32>
    %cst_14 = arith.constant 0.000000e+00 : f32
    %29 = vector.broadcast %cst_14 : f32 to vector<128x128xf32>
    %30 = arith.select %27, %23, %29 : vector<128x128xi1>, vector<128x128xf32>
    %cst_15 = arith.constant dense<0.000000e+00> : vector<128xf32>
    %31 = vector.multi_reduction <add>, %30, %cst_15 [1] : vector<128x128xf32> to vector<128xf32>
    %32 = vector.shape_cast %31 : vector<128xf32> to vector<128x1xf32>
    %33 = arith.addf %28, %32 : vector<128x1xf32>
    %c0_16 = arith.constant 0 : index
    %c0_17 = arith.constant 0 : index
    %34 = vector.load %arg5[%c0_16, %c0_17] : memref<128x1xf32, #tpu.memory_space<vmem>>, vector<128x1xf32>
    tpu.vector_store %arg5[%c0_16, %c0_17], %33 {strides = array<i32>} : memref<128x1xf32, #tpu.memory_space<vmem>>, vector<128x1xf32>,
    %c0_i32_18 = arith.constant 0 : i32
    %35 = arith.cmpi eq, %arg1, %c0_i32_18 : i32
    %36 = arith.extui %35 : i1 to i32
    %cst_19 = arith.constant 14.2857141 : f32
    %c0_i32_20 = arith.constant 0 : i32
    %37 = arith.cmpi ne, %36, %c0_i32_20 : i32
    scf.if %37 {
      %c0_21 = arith.constant 0 : index
      %c0_22 = arith.constant 0 : index
      %38 = vector.load %arg6[%c0_21, %c0_22] : memref<128x1xf32, #tpu.memory_space<vmem>>, vector<128x1xf32>
      %39 = vector.broadcast %cst_19 : f32 to vector<128x1xf32>
      %40 = arith.mulf %39, %38 : vector<128x1xf32>
      %c0_23 = arith.constant 0 : index
      %c0_24 = arith.constant 0 : index
      %41 = vector.load %arg5[%c0_23, %c0_24] : memref<128x1xf32, #tpu.memory_space<vmem>>, vector<128x1xf32>
      %42 = math.log %41 : vector<128x1xf32>
      %43 = vector.broadcast %cst_19 : f32 to vector<128x1xf32>
      %44 = arith.addf %43, %42 : vector<128x1xf32>
      %cst_25 = arith.constant 8.000000e+00 : f32
      %45 = vector.broadcast %cst_25 : f32 to vector<128x1xf32>
      %46 = arith.mulf %45, %44 : vector<128x1xf32>
      %47 = arith.subf %40, %46 : vector<128x1xf32>
      %48 = vector.extract_strided_slice %9 {offsets = [0, 0], sizes = [128, 1], strides = [1, 1]} : vector<128x128xi32> to vector<128x1xi32>
      %c8_i32_26 = arith.constant 8 : i32
      %49 = vector.broadcast %c8_i32_26 : i32 to vector<128x1xi32>
      %50 = arith.cmpi slt, %48, %49 : vector<128x1xi32>
      %cst_27 = arith.constant 0.000000e+00 : f32
      %51 = vector.broadcast %cst_27 : f32 to vector<128x1xf32>
      %52 = arith.select %50, %47, %51 : vector<128x1xi1>, vector<128x1xf32>
      %c0_28 = arith.constant 0 : index
      %c0_29 = arith.constant 0 : index
      %53 = vector.load %arg4[%c0_28, %c0_29] : memref<128x1xf32, #tpu.memory_space<vmem>>, vector<128x1xf32>
      tpu.vector_store %arg4[%c0_28, %c0_29], %52 {strides = array<i32>} : memref<128x1xf32, #tpu.memory_space<vmem>>, vector<128x1xf32>,
    } else {
    }
    return
  }
  func.func @transform_0(%arg0: i32, %arg1: i32) -> (i32, i32) {
    %c0_i32 = arith.constant 0 : i32
    %c0_i32_0 = arith.constant 0 : i32
    return %arg0, %c0_i32 : i32, i32
  }
  func.func @transform_1(%arg0: i32, %arg1: i32) -> (i32, i32) {
    %c0_i32 = arith.constant 0 : i32
    %c0_i32_0 = arith.constant 0 : i32
    return %arg1, %c0_i32 : i32, i32
  }
  func.func @transform_2(%arg0: i32, %arg1: i32) -> (i32, i32) {
    %c0_i32 = arith.constant 0 : i32
    %c0_i32_0 = arith.constant 0 : i32
    return %arg0, %c0_i32 : i32, i32
  }
}

</mosaic_0001>

<bundles_post_ra>
// kernel: tpu_custom_call.1
= control target key start
LH: loop header
LB: loop body
LE: loop exit
PB: predicated region body
PF: predicated region fallthrough
CT: control target
= control target key end

     0   :  { %vm80_vm0 = vcmask 261120   ;;  %vm15_vm1 = vcmask 7168   ;;  %v1022_v32 = vmov 0.0   ;;  %v323_v54 = vlaneseq  ;;  %s1505_s1 = inlined_call_operand.vmem [shape: f32[128,32], index: 1, kind: input, shape index: {}]   ;;  %s1506_s0 = inlined_call_operand.vmem [shape: f32[128,32], index: 0, kind: input, shape index: {}]   ;;  %s1507_s2 = inlined_call_operand.vmem [shape: f32[128,1], index: 2, kind: output, shape index: {}]  }
   0x1   :  { %v79_v0 = vld [vmem:[%s1505_s1 + $0x78] sm:$0xff]  ;;  %v78_v1 = vld [vmem:[%s1505_s1 + $0x70] sm:$0xff]  ;;  %v77_v2 = vld [vmem:[%s1505_s1 + $0x68] sm:$0xff]  ;;  %41 = vst.msk [vmem:[#allocation3 + $0x48] sm:$0xff] %vm15_vm1, %v1022_v32 }
   0x2   :  { %899 = vmatprep.subr.msk.mxu0 %vm80_vm0, %v79_v0  ;;  %955 = vmatprep.subr.msk.mxu1 %vm80_vm0, %v79_v0  ;;  %v48_v3 = vld [vmem:[%s1506_s0] sm:$0xff]  ;;  %v75_v6 = vld [vmem:[%s1505_s1 + $0x58] sm:$0xff]  ;;  %v74_v7 = vld [vmem:[%s1505_s1 + $0x50] sm:$0xff]  ;;  %16 = vst.msk [vmem:[#allocation2] sm:$0xff] %vm15_vm1, %v1022_v32  ;;  %v1278_v63 = vshrl.u32 %v323_v54, 7 }
   0x3   :  { %900 = vmatpush3.xpose.msk.msra.mxu0 %vm80_vm0, %v79_v0  ;;  %971 = vmatpush3.xpose.msk.msra.mxu1 %vm80_vm0, %v79_v0  ;;  %v56_v4 = vld [vmem:[%s1506_s0 + $0x40] sm:$0xff]  ;;  %v73_v8 = vld [vmem:[%s1505_s1 + $0x48] sm:$0xff]  ;;  %v71_v10 = vld [vmem:[%s1505_s1 + $0x38] sm:$0xff]  ;;  %17 = vst.msk [vmem:[#allocation2 + $0x8] sm:$0xff] %vm15_vm1, %v1022_v32  ;;  %v1280_v0 = vand.u32 127, %v323_v54 }
   0x4   :  { %901 = vmatprep.subr.msk.mxu0 %vm80_vm0, %v78_v1  ;;  %956 = vmatprep.subr.msk.mxu1 %vm80_vm0, %v78_v1  ;;  %v76_v5 = vld [vmem:[%s1505_s1 + $0x60] sm:$0xff]  ;;  %v70_v11 = vld [vmem:[%s1505_s1 + $0x30] sm:$0xff]  ;;  %v69_v12 = vld [vmem:[%s1505_s1 + $0x28] sm:$0xff]  ;;  %18 = vst.msk [vmem:[#allocation2 + $0x10] sm:$0xff] %vm15_vm1, %v1022_v32 }
   0x5   :  { %931 = vmatprep.mubr.msk.f32.mxu0 %vm80_vm0, %v48_v3  ;;  %943 = vmatprep.mubr.msk.f32.mxu1 %vm80_vm0, %v56_v4  ;;  %v72_v9 = vld [vmem:[%s1505_s1 + $0x40] sm:$0xff]  ;;  %v67_v14 = vld [vmem:[%s1505_s1 + $0x18] sm:$0xff]  ;;  %v66_v15 = vld [vmem:[%s1505_s1 + $0x10] sm:$0xff]  ;;  %19 = vst.msk [vmem:[#allocation2 + $0x18] sm:$0xff] %vm15_vm1, %v1022_v32  ;;  %vm507_vm2 = vcmp.ne.s32.totalorder %v1278_v63, %v1280_v0  ;;  %vm523_vm3 = vcmp.lt.s32.totalorder %v1280_v0, 8 }
   0x6   :  { %v68_v13 = vld [vmem:[%s1505_s1 + $0x20] sm:$0xff]  ;;  %v65_v16 = vld [vmem:[%s1505_s1 + $0x8] sm:$0xff]  ;;  %v50_v20 = vld [vmem:[%s1506_s0 + $0x10] sm:$0xff]  ;;  %20 = vst.msk [vmem:[#allocation2 + $0x20] sm:$0xff] %vm15_vm1, %v1022_v32 }
   0x7   :  { %902 = vmatpush3.xpose.msk.msra.mxu0 %vm80_vm0, %v78_v1  ;;  %972 = vmatpush3.xpose.msk.msra.mxu1 %vm80_vm0, %v78_v1  ;;  %v64_v17 = vld [vmem:[%s1505_s1] sm:$0xff]  ;;  %v49_v18 = vld [vmem:[%s1506_s0 + $0x8] sm:$0xff]  ;;  %v58_v21 = vld [vmem:[%s1506_s0 + $0x50] sm:$0xff]  ;;  %21 = vst.msk [vmem:[#allocation2 + $0x28] sm:$0xff] %vm15_vm1, %v1022_v32 }
   0x8   :  { %903 = vmatprep.subr.msk.mxu0 %vm80_vm0, %v77_v2  ;;  %957 = vmatprep.subr.msk.mxu1 %vm80_vm0, %v77_v2  ;;  %v57_v19 = vld [vmem:[%s1506_s0 + $0x48] sm:$0xff]  ;;  %v51_v22 = vld [vmem:[%s1506_s0 + $0x18] sm:$0xff]  ;;  %v52_v24 = vld [vmem:[%s1506_s0 + $0x20] sm:$0xff]  ;;  %22 = vst.msk [vmem:[#allocation2 + $0x30] sm:$0xff] %vm15_vm1, %v1022_v32 }
   0x9   :  { %v59_v23 = vld [vmem:[%s1506_s0 + $0x58] sm:$0xff]  ;;  %v60_v25 = vld [vmem:[%s1506_s0 + $0x60] sm:$0xff]  ;;  %v53_v26 = vld [vmem:[%s1506_s0 + $0x28] sm:$0xff]  ;;  %23 = vst.msk [vmem:[#allocation2 + $0x38] sm:$0xff] %vm15_vm1, %v1022_v32 }
   0xa   :  { %v61_v27 = vld [vmem:[%s1506_s0 + $0x68] sm:$0xff]  ;;  %v54_v28 = vld [vmem:[%s1506_s0 + $0x30] sm:$0xff]  ;;  %v55_v30 = vld [vmem:[%s1506_s0 + $0x38] sm:$0xff]  ;;  %24 = vst.msk [vmem:[#allocation2 + $0x40] sm:$0xff] %vm15_vm1, %v1022_v32 }
   0xb   :  { %904 = vmatpush3.xpose.msk.msra.mxu0 %vm80_vm0, %v77_v2  ;;  %973 = vmatpush3.xpose.msk.msra.mxu1 %vm80_vm0, %v77_v2  ;;  %v62_v29 = vld [vmem:[%s1506_s0 + $0x70] sm:$0xff]  ;;  %v63_v31 = vld [vmem:[%s1506_s0 + $0x78] sm:$0xff]  ;;  %25 = vst.msk [vmem:[#allocation2 + $0x48] sm:$0xff] %vm15_vm1, %v1022_v32  ;;  %26 = vst.msk [vmem:[#allocation2 + $0x50] sm:$0xff] %vm15_vm1, %v1022_v32 }
   0xc   :  { %905 = vmatprep.subr.msk.mxu0 %vm80_vm0, %v76_v5  ;;  %958 = vmatprep.subr.msk.mxu1 %vm80_vm0, %v76_v5  ;;  %27 = vst.msk [vmem:[#allocation2 + $0x58] sm:$0xff] %vm15_vm1, %v1022_v32  ;;  %28 = vst.msk [vmem:[#allocation2 + $0x60] sm:$0xff] %vm15_vm1, %v1022_v32 }
   0xd   :  { %29 = vst.msk [vmem:[#allocation2 + $0x68] sm:$0xff] %vm15_vm1, %v1022_v32  ;;  %30 = vst.msk [vmem:[#allocation2 + $0x70] sm:$0xff] %vm15_vm1, %v1022_v32 }
   0xe   :  { %31 = vst.msk [vmem:[#allocation2 + $0x78] sm:$0xff] %vm15_vm1, %v1022_v32  ;;  %32 = vst.msk [vmem:[#allocation3] sm:$0xff] %vm15_vm1, %v1022_v32 }
   0xf   :  { %906 = vmatpush3.xpose.msk.msra.mxu0 %vm80_vm0, %v76_v5  ;;  %974 = vmatpush3.xpose.msk.msra.mxu1 %vm80_vm0, %v76_v5  ;;  %33 = vst.msk [vmem:[#allocation3 + $0x8] sm:$0xff] %vm15_vm1, %v1022_v32  ;;  %34 = vst.msk [vmem:[#allocation3 + $0x10] sm:$0xff] %vm15_vm1, %v1022_v32 }
  0x10   :  { %907 = vmatprep.subr.msk.mxu0 %vm80_vm0, %v75_v6  ;;  %959 = vmatprep.subr.msk.mxu1 %vm80_vm0, %v75_v6  ;;  %35 = vst.msk [vmem:[#allocation3 + $0x18] sm:$0xff] %vm15_vm1, %v1022_v32  ;;  %36 = vst.msk [vmem:[#allocation3 + $0x20] sm:$0xff] %vm15_vm1, %v1022_v32 }
  0x11   :  { %37 = vst.msk [vmem:[#allocation3 + $0x28] sm:$0xff] %vm15_vm1, %v1022_v32  ;;  %38 = vst.msk [vmem:[#allocation3 + $0x30] sm:$0xff] %vm15_vm1, %v1022_v32 }
  0x12   :  { %39 = vst.msk [vmem:[#allocation3 + $0x38] sm:$0xff] %vm15_vm1, %v1022_v32  ;;  %40 = vst.msk [vmem:[#allocation3 + $0x40] sm:$0xff] %vm15_vm1, %v1022_v32 }
  0x13   :  { %908 = vmatpush3.xpose.msk.msra.mxu0 %vm80_vm0, %v75_v6  ;;  %975 = vmatpush3.xpose.msk.msra.mxu1 %vm80_vm0, %v75_v6  ;;  %42 = vst.msk [vmem:[#allocation3 + $0x50] sm:$0xff] %vm15_vm1, %v1022_v32  ;;  %43 = vst.msk [vmem:[#allocation3 + $0x58] sm:$0xff] %vm15_vm1, %v1022_v32 }
  0x14   :  { %909 = vmatprep.subr.msk.mxu0 %vm80_vm0, %v74_v7  ;;  %960 = vmatprep.subr.msk.mxu1 %vm80_vm0, %v74_v7  ;;  %44 = vst.msk [vmem:[#allocation3 + $0x60] sm:$0xff] %vm15_vm1, %v1022_v32  ;;  %45 = vst.msk [vmem:[#allocation3 + $0x68] sm:$0xff] %vm15_vm1, %v1022_v32 }
  0x15   :  { %46 = vst.msk [vmem:[#allocation3 + $0x70] sm:$0xff] %vm15_vm1, %v1022_v32  ;;  %47 = vst.msk [vmem:[#allocation3 + $0x78] sm:$0xff] %vm15_vm1, %v1022_v32 }
  0x16   :  { %vm524_vm4 = vmand %vm507_vm2, %vm523_vm3  ;;  %800 = vst.msk [vmem:[%s1507_s2 + $0x8] sm:$0xff] %vm15_vm1, %v1022_v32 }
  0x17   :  { %910 = vmatpush3.xpose.msk.msra.mxu0 %vm80_vm0, %v74_v7  ;;  %976 = vmatpush3.xpose.msk.msra.mxu1 %vm80_vm0, %v74_v7  ;;  %801 = vst.msk [vmem:[%s1507_s2 + $0x10] sm:$0xff] %vm15_vm1, %v1022_v32  ;;  %802 = vst.msk [vmem:[%s1507_s2 + $0x18] sm:$0xff] %vm15_vm1, %v1022_v32 }
  0x18   :  { %911 = vmatprep.subr.msk.mxu0 %vm80_vm0, %v73_v8  ;;  %961 = vmatprep.subr.msk.mxu1 %vm80_vm0, %v73_v8  ;;  %803 = vst.msk [vmem:[%s1507_s2 + $0x20] sm:$0xff] %vm15_vm1, %v1022_v32  ;;  %804 = vst.msk [vmem:[%s1507_s2 + $0x28] sm:$0xff] %vm15_vm1, %v1022_v32 }
  0x19   :  { %805 = vst.msk [vmem:[%s1507_s2 + $0x30] sm:$0xff] %vm15_vm1, %v1022_v32  ;;  %806 = vst.msk [vmem:[%s1507_s2 + $0x38] sm:$0xff] %vm15_vm1, %v1022_v32 }
  0x1a   :  { %807 = vst.msk [vmem:[%s1507_s2 + $0x40] sm:$0xff] %vm15_vm1, %v1022_v32  ;;  %808 = vst.msk [vmem:[%s1507_s2 + $0x48] sm:$0xff] %vm15_vm1, %v1022_v32 }
  0x1b   :  { %912 = vmatpush3.xpose.msk.msra.mxu0 %vm80_vm0, %v73_v8  ;;  %977 = vmatpush3.xpose.msk.msra.mxu1 %vm80_vm0, %v73_v8  ;;  %809 = vst.msk [vmem:[%s1507_s2 + $0x50] sm:$0xff] %vm15_vm1, %v1022_v32  ;;  %810 = vst.msk [vmem:[%s1507_s2 + $0x58] sm:$0xff] %vm15_vm1, %v1022_v32 }
  0x1c   :  { %913 = vmatprep.subr.msk.mxu0 %vm80_vm0, %v72_v9  ;;  %962 = vmatprep.subr.msk.mxu1 %vm80_vm0, %v72_v9  ;;  %811 = vst.msk [vmem:[%s1507_s2 + $0x60] sm:$0xff] %vm15_vm1, %v1022_v32  ;;  %812 = vst.msk [vmem:[%s1507_s2 + $0x68] sm:$0xff] %vm15_vm1, %v1022_v32 }
  0x1d   :  { %813 = vst.msk [vmem:[%s1507_s2 + $0x70] sm:$0xff] %vm15_vm1, %v1022_v32  ;;  %814 = vst.msk [vmem:[%s1507_s2 + $0x78] sm:$0xff] %vm15_vm1, %v1022_v32 }
  0x1f   :  { %914 = vmatpush3.xpose.msk.msra.mxu0 %vm80_vm0, %v72_v9  ;;  %978 = vmatpush3.xpose.msk.msra.mxu1 %vm80_vm0, %v72_v9 }
  0x20   :  { %915 = vmatprep.subr.msk.mxu0 %vm80_vm0, %v71_v10  ;;  %963 = vmatprep.subr.msk.mxu1 %vm80_vm0, %v71_v10 }
  0x23   :  { %916 = vmatpush3.xpose.msk.msra.mxu0 %vm80_vm0, %v71_v10  ;;  %979 = vmatpush3.xpose.msk.msra.mxu1 %vm80_vm0, %v71_v10  ;;  %v325_v10 = vadd.s32 8, %v1278_v63 }
  0x24   :  { %917 = vmatprep.subr.msk.mxu0 %vm80_vm0, %v70_v11  ;;  %964 = vmatprep.subr.msk.mxu1 %vm80_vm0, %v70_v11 }
  0x25   :  { %vm508_vm5 = vcmp.ne.s32.totalorder %v325_v10, %v1280_v0  ;;  %v330_v10 = vadd.s32 48, %v1278_v63 }
  0x26   :  { %vm1296_vm6 = vmand %vm508_vm5, %vm523_vm3 }
  0x27   :  { %918 = vmatpush3.xpose.msk.msra.mxu0 %vm80_vm0, %v70_v11  ;;  %980 = vmatpush3.xpose.msk.msra.mxu1 %vm80_vm0, %v70_v11 }
  0x28   :  { %919 = vmatprep.subr.msk.mxu0 %vm80_vm0, %v69_v12  ;;  %965 = vmatprep.subr.msk.mxu1 %vm80_vm0, %v69_v12 }
  0x2b   :  { %920 = vmatpush3.xpose.msk.msra.mxu0 %vm80_vm0, %v69_v12  ;;  %981 = vmatpush3.xpose.msk.msra.mxu1 %vm80_vm0, %v69_v12 }
  0x2c   :  { %921 = vmatprep.subr.msk.mxu0 %vm80_vm0, %v68_v13  ;;  %966 = vmatprep.subr.msk.mxu1 %vm80_vm0, %v68_v13 }
  0x2f   :  { %922 = vmatpush3.xpose.msk.msra.mxu0 %vm80_vm0, %v68_v13  ;;  %982 = vmatpush3.xpose.msk.msra.mxu1 %vm80_vm0, %v68_v13 }
  0x30   :  { %923 = vmatprep.subr.msk.mxu0 %vm80_vm0, %v67_v14  ;;  %967 = vmatprep.subr.msk.mxu1 %vm80_vm0, %v67_v14 }
  0x33   :  { %924 = vmatpush3.xpose.msk.msra.mxu0 %vm80_vm0, %v67_v14  ;;  %983 = vmatpush3.xpose.msk.msra.mxu1 %vm80_vm0, %v67_v14 }
  0x34   :  { %925 = vmatprep.subr.msk.mxu0 %vm80_vm0, %v66_v15  ;;  %968 = vmatprep.subr.msk.mxu1 %vm80_vm0, %v66_v15 }
  0x37   :  { %926 = vmatpush3.xpose.msk.msra.mxu0 %vm80_vm0, %v66_v15  ;;  %984 = vmatpush3.xpose.msk.msra.mxu1 %vm80_vm0, %v66_v15 }
  0x38   :  { %927 = vmatprep.subr.msk.mxu0 %vm80_vm0, %v65_v16  ;;  %969 = vmatprep.subr.msk.mxu1 %vm80_vm0, %v65_v16 }
  0x3b   :  { %928 = vmatpush3.xpose.msk.msra.mxu0 %vm80_vm0, %v65_v16  ;;  %985 = vmatpush3.xpose.msk.msra.mxu1 %vm80_vm0, %v65_v16 }
  0x3c   :  { %929 = vmatprep.subr.msk.mxu0 %vm80_vm0, %v64_v17  ;;  %970 = vmatprep.subr.msk.mxu1 %vm80_vm0, %v64_v17 }
  0x3f   :  { %930 = vmatpush3.xpose.msk.msra.mxu0 %vm80_vm0, %v64_v17  ;;  %986 = vmatpush3.xpose.msk.msra.mxu1 %vm80_vm0, %v64_v17 }
  0x42   :  { %932 = vmatmul.mubr.msk.f32.vlgmr.msra.gmra.mxu0 %vm80_vm0, %v49_v18  ;;  %944 = vmatmul.mubr.msk.f32.vlgmr.msra.gmra.mxu1 %vm80_vm0, %v57_v19  ;;  %v333_v19 = vadd.s32 72, %v1278_v63 }
  0x43   :  { %934 = vmatprep.mubr.msk.f32.mxu0 %vm80_vm0, %v50_v20  ;;  %946 = vmatprep.mubr.msk.f32.mxu1 %vm80_vm0, %v58_v21  ;;  %v332_v21 = vadd.s32 64, %v1278_v63 }
  0x44   :  { %vm516_vm7 = vcmp.ne.s32.totalorder %v333_v19, %v1280_v0 }
  0x45   :  { %vm515_vm8 = vcmp.ne.s32.totalorder %v332_v21, %v1280_v0  ;;  %vm1308_vm9 = vmand %vm516_vm7, %vm523_vm3 }
  0x46   :  { %935 = vmatmul.mubr.msk.f32.gmra.mxu0 %vm80_vm0, %v51_v22  ;;  %947 = vmatmul.mubr.msk.f32.gmra.mxu1 %vm80_vm0, %v59_v23  ;;  %vm1316_vm10 = vmand %vm515_vm8, %vm523_vm3 }
  0x47   :  { %937 = vmatprep.mubr.msk.f32.mxu0 %vm80_vm0, %v52_v24  ;;  %949 = vmatprep.mubr.msk.f32.mxu1 %vm80_vm0, %v60_v25 }
  0x4a   :  { %938 = vmatmul.mubr.msk.f32.gmra.mxu0 %vm80_vm0, %v53_v26  ;;  %950 = vmatmul.mubr.msk.f32.gmra.mxu1 %vm80_vm0, %v61_v27 }
  0x4b   :  { %940 = vmatprep.mubr.msk.f32.mxu0 %vm80_vm0, %v54_v28  ;;  %952 = vmatprep.mubr.msk.f32.mxu1 %vm80_vm0, %v62_v29 }
  0x4e   :  { %941 = vmatmul.mubr.msk.f32.gmra.mxu0 %vm80_vm0, %v55_v30  ;;  %953 = vmatmul.mubr.msk.f32.gmra.mxu1 %vm80_vm0, %v63_v31  ;;  %v326_v31 = vadd.s32 16, %v1278_v63 }
  0x50   :  { %vm509_vm11 = vcmp.ne.s32.totalorder %v326_v31, %v1280_v0 }
  0x51   :  { %vm1330_vm13 = vmand %vm509_vm11, %vm523_vm3 }
 0x102   :  { %v933_v33 = vpop.f32.mrf.mxu0  ;;  %v945_v34 = vpop.f32.mrf.mxu1 }
 0x103   :  { %396 = vadd.xlane.f32.xlu0 %v945_v34  ;;  %380 = vadd.xlane.f32.xlu1 %v933_v33  ;;  %v852_v37 = vadd.f32 -1.0, %v933_v33  ;;  %v860_v41 = vadd.f32 -1.0, %v945_v34  ;;  %v327_v34 = vadd.s32 24, %v1278_v63 }
 0x104   :  { %v243_v35 = vpop.f32.mrf.mxu0  ;;  %v283_v38 = vpop.f32.mrf.mxu1 }
 0x105   :  { %v851_v36 = vadd.f32 -1.0, %v243_v35  ;;  %v460_v42 = vmul.f32 14.285714, %v852_v37  ;;  %v859_v44 = vadd.f32 -1.0, %v283_v38  ;;  %v468_v47 = vmul.f32 14.285714, %v860_v41 }
 0x106   :  { %v936_v39 = vpop.f32.mrf.mxu0  ;;  %v948_v46 = vpop.f32.mrf.mxu1  ;;  %vm510_vm12 = vcmp.ne.s32.totalorder %v327_v34, %v1280_v0  ;;  %v362_v34 = vld [vmem:[#allocation3] sm:$0xff] }
 0x107   :  { %v459_v40 = vmul.f32 14.285714, %v851_v36  ;;  %394 = vadd.xlane.f32.xlu1 %v283_v38  ;;  %378 = vadd.xlane.f32.xlu0 %v243_v35  ;;  %v854_v48 = vadd.f32 -1.0, %v936_v39  ;;  %v477_v49 = vmul.f32 1.442695, %v460_v42  ;;  %v862_v57 = vadd.f32 -1.0, %v948_v46  ;;  %vm1338_vm14 = vmand %vm510_vm12, %vm523_vm3 }
 0x108   :  { %v253_v45 = vpop.f32.mrf.mxu0  ;;  %v467_v50 = vmul.f32 14.285714, %v859_v44  ;;  %v293_v52 = vpop.f32.mrf.mxu1  ;;  %v493_v55 = vmul.f32 1.442695, %v468_v47  ;;  %v373_v44 = vld [vmem:[#allocation3 + $0x58] sm:$0xff] }
 0x109   :  { %v475_v43 = vmul.f32 1.442695, %v459_v40  ;;  %v853_v51 = vadd.f32 -1.0, %v253_v45  ;;  %v462_v56 = vmul.f32 14.285714, %v854_v48  ;;  %v861_v60 = vadd.f32 -1.0, %v293_v52 }
 0x10a   :  { %v939_v53 = vpop.f32.mrf.mxu0  ;;  %v491_v58 = vmul.f32 1.442695, %v467_v50  ;;  %v951_v62 = vpop.f32.mrf.mxu1  ;;  %v470_v2 = vmul.f32 14.285714, %v862_v57  ;;  %v328_v57 = vadd.s32 32, %v1278_v63 }
 0x10b   :  { %384 = vadd.xlane.f32.xlu0 %v936_v39  ;;  %382 = vadd.xlane.f32.xlu1 %v253_v45  ;;  %988 = vpow2.f32 %v475_v43  ;;  %v461_v59 = vmul.f32 14.285714, %v853_v51  ;;  %v481_v1 = vmul.f32 1.442695, %v462_v56  ;;  %v856_v3 = vadd.f32 -1.0, %v939_v53  ;;  %v375_v56 = vld [vmem:[#allocation3 + $0x68] sm:$0xff] }
 0x10c   :  { %990 = vpow2.f32 %v477_v49  ;;  %v263_v61 = vpop.f32.mrf.mxu0  ;;  %v469_v5 = vmul.f32 14.285714, %v861_v60  ;;  %v303_v7 = vpop.f32.mrf.mxu1  ;;  %v864_v9 = vadd.f32 -1.0, %v951_v62  ;;  %v497_v11 = vmul.f32 1.442695, %v470_v2 }
 0x10d   :  { %992 = vpow2.f32 %v493_v55  ;;  %v479_v4 = vmul.f32 1.442695, %v461_v59  ;;  %v855_v6 = vadd.f32 -1.0, %v263_v61  ;;  %v464_v12 = vmul.f32 14.285714, %v856_v3 }
 0x10e   :  { %994 = vpow2.f32 %v491_v58  ;;  %v942_v8 = vpop.f32.mrf.mxu0  ;;  %v863_v13 = vadd.f32 -1.0, %v303_v7  ;;  %v495_v14 = vmul.f32 1.442695, %v469_v5  ;;  %v954_v17 = vpop.f32.mrf.mxu1  ;;  %v472_v20 = vmul.f32 14.285714, %v864_v9 }
 0x10f   :  { %400 = vadd.xlane.f32.xlu0 %v948_v46  ;;  %398 = vadd.xlane.f32.xlu1 %v293_v52  ;;  %996 = vpow2.f32 %v481_v1  ;;  %v463_v15 = vmul.f32 14.285714, %v855_v6  ;;  %v485_v22 = vmul.f32 1.442695, %v464_v12  ;;  %v858_v24 = vadd.f32 -1.0, %v942_v8 }
 0x110   :  { %998 = vpow2.f32 %v479_v4  ;;  %v273_v16 = vpop.f32.mrf.mxu0  ;;  %v471_v23 = vmul.f32 14.285714, %v863_v13  ;;  %v313_v27 = vpop.f32.mrf.mxu1  ;;  %v866_v33 = vadd.f32 -1.0, %v954_v17  ;;  %v501_v35 = vmul.f32 1.442695, %v472_v20 }
 0x111   :  { %1000 = vpow2.f32 %v497_v11  ;;  %v483_v25 = vmul.f32 1.442695, %v463_v15  ;;  %v857_v26 = vadd.f32 -1.0, %v273_v16  ;;  %v466_v36 = vmul.f32 14.285714, %v858_v24 }
 0x112   :  { %1002 = vpow2.f32 %v495_v14  ;;  %v865_v37 = vadd.f32 -1.0, %v313_v27  ;;  %v499_v39 = vmul.f32 1.442695, %v471_v23  ;;  %v334_v45 = vadd.s32 80, %v1278_v63 }
 0x113   :  { %388 = vadd.xlane.f32.xlu0 %v939_v53  ;;  %386 = vadd.xlane.f32.xlu1 %v263_v61  ;;  %1004 = vpow2.f32 %v485_v22  ;;  %v465_v40 = vmul.f32 14.285714, %v857_v26  ;;  %v335_v46 = vadd.s32 88, %v1278_v63  ;;  %v489_v47 = vmul.f32 1.442695, %v466_v36  ;;  %v371_v26 = vld [vmem:[#allocation3 + $0x48] sm:$0xff] }
 0x114   :  { %1006 = vpow2.f32 %v483_v25  ;;  %v474_v48 = vmul.f32 14.285714, %v866_v33  ;;  %v473_v49 = vmul.f32 14.285714, %v865_v37  ;;  %vm517_vm15 = vcmp.ne.s32.totalorder %v334_v45, %v1280_v0  ;;  %v370_v33 = vld [vmem:[#allocation3 + $0x40] sm:$0xff]  ;;  %v372_v45 = vld [vmem:[#allocation3 + $0x50] sm:$0xff] }
 0x115   :  { %1008 = vpow2.f32 %v501_v35  ;;  %v487_v51 = vmul.f32 1.442695, %v465_v40  ;;  %vm518_vm0 = vcmp.ne.s32.totalorder %v335_v46, %v1280_v0  ;;  %v329_v58 = vadd.s32 40, %v1278_v63  ;;  %vm1429_vm2 = vmand %vm517_vm15, %vm523_vm3 }
 0x116   :  { %1010 = vpow2.f32 %v499_v39  ;;  %v505_v59 = vmul.f32 1.442695, %v474_v48  ;;  %v503_v61 = vmul.f32 1.442695, %v473_v49  ;;  %vm511_vm5 = vcmp.ne.s32.totalorder %v328_v57, %v1280_v0  ;;  %v364_v39 = vld [vmem:[#allocation3 + $0x10] sm:$0xff]  ;;  %v374_v57 = vld [vmem:[#allocation3 + $0x60] sm:$0xff] }
 0x117   :  { %404 = vadd.xlane.f32.xlu0 %v951_v62  ;;  %402 = vadd.xlane.f32.xlu1 %v303_v7  ;;  %1012 = vpow2.f32 %v489_v47  ;;  %v336_v3 = vadd.s32 96, %v1278_v63  ;;  %v337_v4 = vadd.s32 104, %v1278_v63  ;;  %vm528_vm7 = vmand %vm511_vm5, %vm523_vm3  ;;  %v331_v9 = vadd.s32 56, %v1278_v63 }
 0x118   :  { %v989_v18 = vpop.eup %988  ;;  %1014 = vpow2.f32 %v487_v51  ;;  %v339_v15 = vadd.s32 120, %v1278_v63  ;;  %v366_v51 = vld [vmem:[#allocation3 + $0x20] sm:$0xff] }
 0x119   :  { %v556_v28 = vsel %vm524_vm4, %v989_v18, 0.0  ;;  %v991_v29 = vpop.eup %990  ;;  %vm535_vm4 = vmand %vm518_vm0, %vm523_vm3  ;;  %1016 = vpow2.f32 %v505_v59 }
 0x11a   :  { %v993_v38 = vpop.eup %992  ;;  %v557_v41 = vsel %vm1296_vm6, %v991_v29, 0.0  ;;  %vm512_vm6 = vcmp.ne.s32.totalorder %v329_v58, %v1280_v0  ;;  %1018 = vpow2.f32 %v503_v61 }
 0x11b   :  { %392 = vadd.xlane.f32.xlu0 %v942_v8  ;;  %390 = vadd.xlane.f32.xlu1 %v273_v16  ;;  %v995_v43 = vpop.eup %994  ;;  %v565_v53 = vsel %vm1308_vm9, %v993_v38, 0.0  ;;  %vm529_vm8 = vmand %vm512_vm6, %vm523_vm3  ;;  %vm519_vm9 = vcmp.ne.s32.totalorder %v336_v3, %v1280_v0  ;;  %v338_v16 = vadd.s32 112, %v1278_v63  ;;  %v365_v38 = vld [vmem:[#allocation3 + $0x18] sm:$0xff] }
 0x11c   :  { %v997_v50 = vpop.eup %996  ;;  %v564_v52 = vsel %vm1316_vm10, %v995_v43, 0.0  ;;  %vm520_vm10 = vcmp.ne.s32.totalorder %v337_v4, %v1280_v0  ;;  %vm536_vm11 = vmand %vm519_vm9, %vm523_vm3 }
 0x11d   :  { %v999_v55 = vpop.eup %998  ;;  %v559_v1 = vsel %vm1338_vm14, %v997_v50, 0.0  ;;  %vm537_vm12 = vmand %vm520_vm10, %vm523_vm3  ;;  %vm513_vm14 = vcmp.ne.s32.totalorder %v330_v10, %v1280_v0  ;;  %v367_v50 = vld [vmem:[#allocation3 + $0x28] sm:$0xff] }
 0x11e   :  { %v1001_v60 = vpop.eup %1000  ;;  %v558_v62 = vsel %vm1330_vm13, %v999_v55, 0.0  ;;  %vm514_vm13 = vcmp.ne.s32.totalorder %v331_v9, %v1280_v0  ;;  %vm530_vm0 = vmand %vm513_vm14, %vm523_vm3 }
 0x11f   :  { %572 = vadd.xlane.f32.xlu0 %v556_v28  ;;  %406 = vadd.xlane.f32.xlu1 %v313_v27  ;;  %v1003_v32 = vpop.eup %1002  ;;  %v567_v7 = vsel %vm535_vm4, %v1001_v60, 0.0  ;;  %vm531_vm15 = vmand %vm514_vm13, %vm523_vm3  ;;  %vm521_vm4 = vcmp.ne.s32.totalorder %v338_v16, %v1280_v0  ;;  %v363_v27 = vld [vmem:[#allocation3 + $0x8] sm:$0xff] }
 0x120   :  { %v1005_v5 = vpop.eup %1004  ;;  %v566_v6 = vsel %vm1429_vm2, %v1003_v32, 0.0  ;;  %vm522_vm2 = vcmp.ne.s32.totalorder %v339_v15, %v1280_v0  ;;  %vm538_vm6 = vmand %vm521_vm4, %vm523_vm3 }
 0x121   :  { %v1007_v8 = vpop.eup %1006  ;;  %v561_v13 = vsel %vm529_vm8, %v1005_v5, 0.0  ;;  %vm539_vm5 = vmand %vm522_vm2, %vm523_vm3  ;;  %v540_v5 = vld [vmem:[#allocation2] sm:$0xff] }
 0x122   :  { %v1009_v11 = vpop.eup %1008  ;;  %v560_v12 = vsel %vm528_vm7, %v1007_v8, 0.0 }
 0x123   :  { %408 = vadd.xlane.f32.xlu0 %v954_v17  ;;  %574 = vadd.xlane.f32.xlu1 %v557_v41  ;;  %v1011_v14 = vpop.eup %1010  ;;  %v569_v19 = vsel %vm537_vm12, %v1009_v11, 0.0  ;;  %v377_v11 = vld [vmem:[#allocation3 + $0x78] sm:$0xff] }
 0x124   :  { %v1013_v17 = vpop.eup %1012  ;;  %v568_v18 = vsel %vm536_vm11, %v1011_v14, 0.0 }
 0x125   :  { %v1015_v20 = vpop.eup %1014  ;;  %v563_v22 = vsel %vm531_vm15, %v1013_v17, 0.0  ;;  %v548_v17 = vld [vmem:[#allocation2 + $0x40] sm:$0xff] }
 0x126   :  { %v1017_v21 = vpop.eup %1016  ;;  %v562_v23 = vsel %vm530_vm0, %v1015_v20, 0.0 }
 0x127   :  { %588 = vadd.xlane.f32.xlu0 %v564_v52  ;;  %590 = vadd.xlane.f32.xlu1 %v565_v53  ;;  %v1019_v63 = vpop.eup %1018  ;;  %v571_v24 = vsel %vm539_vm5, %v1017_v21, 0.0 }
 0x128   :  { %v570_v25 = vsel %vm538_vm6, %v1019_v63, 0.0  ;;  %v542_v63 = vld [vmem:[#allocation2 + $0x10] sm:$0xff] }
 0x12b   :  { %576 = vadd.xlane.f32.xlu0 %v558_v62  ;;  %578 = vadd.xlane.f32.xlu1 %v559_v1  ;;  %v369_v62 = vld [vmem:[#allocation3 + $0x38] sm:$0xff]  ;;  %v368_v1 = vld [vmem:[#allocation3 + $0x30] sm:$0xff] }
 0x12f   :  { %592 = vadd.xlane.f32.xlu0 %v566_v6  ;;  %594 = vadd.xlane.f32.xlu1 %v567_v7  ;;  %v376_v6 = vld [vmem:[#allocation3 + $0x70] sm:$0xff] }
 0x133   :  { %580 = vadd.xlane.f32.xlu0 %v560_v12  ;;  %582 = vadd.xlane.f32.xlu1 %v561_v13  ;;  %v541_v12 = vld [vmem:[#allocation2 + $0x8] sm:$0xff] }
 0x137   :  { %596 = vadd.xlane.f32.xlu0 %v568_v18  ;;  %598 = vadd.xlane.f32.xlu1 %v569_v19  ;;  %v549_v18 = vld [vmem:[#allocation2 + $0x48] sm:$0xff] }
 0x13b   :  { %586 = vadd.xlane.f32.xlu1 %v563_v22  ;;  %584 = vadd.xlane.f32.xlu0 %v562_v23 }
 0x13f   :  { %602 = vadd.xlane.f32.xlu1 %v571_v24  ;;  %600 = vadd.xlane.f32.xlu0 %v570_v25  ;;  %v543_v24 = vld [vmem:[#allocation2 + $0x18] sm:$0xff] }
 0x18c   :  { %v397_v28 = vpop.xlane.xlu0 %396  ;;  %v381_v29 = vpop.xlane.xlu1 %380 }
 0x18d   :  { %v419_v30 = vadd.f32 %v397_v28, %v371_v26  ;;  %v411_v31 = vadd.f32 %v381_v29, %v363_v27  ;;  %v550_v29 = vld [vmem:[#allocation2 + $0x50] sm:$0xff] }
 0x18f   :  { %436 = vst.msk [vmem:[#allocation3 + $0x48] sm:$0xff] %vm15_vm1, %v419_v30  ;;  %428 = vst.msk [vmem:[#allocation3 + $0x8] sm:$0xff] %vm15_vm1, %v411_v31  ;;  %v551_v30 = vld [vmem:[#allocation2 + $0x58] sm:$0xff] }
 0x190   :  { %v395_v35 = vpop.xlane.xlu1 %394  ;;  %v379_v36 = vpop.xlane.xlu0 %378 }
 0x191   :  { %v418_v0 = vadd.f32 %v395_v35, %v370_v33  ;;  %v410_v37 = vadd.f32 %v379_v36, %v362_v34  ;;  %v544_v36 = vld [vmem:[#allocation2 + $0x20] sm:$0xff] }
 0x193   :  { %435 = vst.msk [vmem:[#allocation3 + $0x40] sm:$0xff] %vm15_vm1, %v418_v0  ;;  %427 = vst.msk [vmem:[#allocation3] sm:$0xff] %vm15_vm1, %v410_v37  ;;  %v545_v0 = vld [vmem:[#allocation2 + $0x28] sm:$0xff] }
 0x194   :  { %v385_v40 = vpop.xlane.xlu0 %384  ;;  %v383_v41 = vpop.xlane.xlu1 %382 }
 0x195   :  { %v413_v42 = vadd.f32 %v385_v40, %v365_v38  ;;  %v412_v43 = vadd.f32 %v383_v41, %v364_v39  ;;  %v552_v41 = vld [vmem:[#allocation2 + $0x60] sm:$0xff] }
 0x197   :  { %430 = vst.msk [vmem:[#allocation3 + $0x18] sm:$0xff] %vm15_vm1, %v413_v42  ;;  %429 = vst.msk [vmem:[#allocation3 + $0x10] sm:$0xff] %vm15_vm1, %v412_v43  ;;  %v553_v42 = vld [vmem:[#allocation2 + $0x68] sm:$0xff] }
 0x198   :  { %v401_v46 = vpop.xlane.xlu0 %400  ;;  %v399_v47 = vpop.xlane.xlu1 %398 }
 0x199   :  { %v421_v48 = vadd.f32 %v401_v46, %v373_v44  ;;  %v420_v49 = vadd.f32 %v399_v47, %v372_v45 }
 0x19b   :  { %438 = vst.msk [vmem:[#allocation3 + $0x58] sm:$0xff] %vm15_vm1, %v421_v48  ;;  %437 = vst.msk [vmem:[#allocation3 + $0x50] sm:$0xff] %vm15_vm1, %v420_v49  ;;  %v639_v49 = vld [vmem:[#allocation3] sm:$0xff] }
 0x19c   :  { %v389_v52 = vpop.xlane.xlu0 %388  ;;  %v387_v53 = vpop.xlane.xlu1 %386 }
 0x19d   :  { %v415_v54 = vadd.f32 %v389_v52, %v367_v50  ;;  %v414_v55 = vadd.f32 %v387_v53, %v366_v51  ;;  %v547_v50 = vld [vmem:[#allocation2 + $0x38] sm:$0xff]  ;;  %v546_v51 = vld [vmem:[#allocation2 + $0x30] sm:$0xff] }
 0x19f   :  { %432 = vst.msk [vmem:[#allocation3 + $0x28] sm:$0xff] %vm15_vm1, %v415_v54  ;;  %431 = vst.msk [vmem:[#allocation3 + $0x20] sm:$0xff] %vm15_vm1, %v414_v55  ;;  %v655_v55 = vmul.f32 14.285714, %v639_v49 }
 0x1a0   :  { %v405_v58 = vpop.xlane.xlu0 %404  ;;  %v403_v59 = vpop.xlane.xlu1 %402 }
 0x1a1   :  { %v423_v60 = vadd.f32 %v405_v58, %v375_v56  ;;  %v422_v61 = vadd.f32 %v403_v59, %v374_v57  ;;  %v555_v59 = vld [vmem:[#allocation2 + $0x78] sm:$0xff] }
 0x1a3   :  { %440 = vst.msk [vmem:[#allocation3 + $0x68] sm:$0xff] %vm15_vm1, %v423_v60  ;;  %439 = vst.msk [vmem:[#allocation3 + $0x60] sm:$0xff] %vm15_vm1, %v422_v61  ;;  %v554_v60 = vld [vmem:[#allocation2 + $0x70] sm:$0xff] }
 0x1a4   :  { %v393_v2 = vpop.xlane.xlu0 %392  ;;  %v391_v32 = vpop.xlane.xlu1 %390 }
 0x1a5   :  { %v417_v3 = vadd.f32 %v393_v2, %v369_v62  ;;  %v416_v4 = vadd.f32 %v391_v32, %v368_v1 }
 0x1a7   :  { %434 = vst.msk [vmem:[#allocation3 + $0x38] sm:$0xff] %vm15_vm1, %v417_v3  ;;  %433 = vst.msk [vmem:[#allocation3 + $0x30] sm:$0xff] %vm15_vm1, %v416_v4 }
 0x1a8   :  { %v573_v7 = vpop.xlane.xlu0 %572  ;;  %v407_v8 = vpop.xlane.xlu1 %406 }
 0x1a9   :  { %v604_v9 = vadd.f32 %v573_v7, %v540_v5  ;;  %v424_v10 = vadd.f32 %v407_v8, %v376_v6 }
 0x1ab   :  { %620 = vst.msk [vmem:[#allocation2] sm:$0xff] %vm15_vm1, %v604_v9  ;;  %441 = vst.msk [vmem:[#allocation3 + $0x70] sm:$0xff] %vm15_vm1, %v424_v10 }
 0x1ac   :  { %v409_v13 = vpop.xlane.xlu0 %408  ;;  %v575_v14 = vpop.xlane.xlu1 %574 }
 0x1ad   :  { %v425_v15 = vadd.f32 %v409_v13, %v377_v11  ;;  %v605_v16 = vadd.f32 %v575_v14, %v541_v12 }
 0x1af   :  { %442 = vst.msk [vmem:[#allocation3 + $0x78] sm:$0xff] %vm15_vm1, %v425_v15  ;;  %621 = vst.msk [vmem:[#allocation2 + $0x8] sm:$0xff] %vm15_vm1, %v605_v16 }
 0x1b0   :  { %v589_v19 = vpop.xlane.xlu0 %588  ;;  %v591_v20 = vpop.xlane.xlu1 %590 }
 0x1b1   :  { %v612_v21 = vadd.f32 %v589_v19, %v548_v17  ;;  %v613_v22 = vadd.f32 %v591_v20, %v549_v18 }
 0x1b2   :  { %v671_v23 = vld [vmem:[#allocation2] sm:$0xff] }
 0x1b3   :  { %1020 = vlog2.f32 %v671_v23  ;;  %628 = vst.msk [vmem:[#allocation2 + $0x40] sm:$0xff] %vm15_vm1, %v612_v21  ;;  %629 = vst.msk [vmem:[#allocation2 + $0x48] sm:$0xff] %vm15_vm1, %v613_v22 }
 0x1b4   :  { %v577_v25 = vpop.xlane.xlu0 %576  ;;  %v579_v26 = vpop.xlane.xlu1 %578 }
 0x1b5   :  { %v606_v27 = vadd.f32 %v577_v25, %v542_v63  ;;  %v607_v28 = vadd.f32 %v579_v26, %v543_v24 }
 0x1b7   :  { %622 = vst.msk [vmem:[#allocation2 + $0x10] sm:$0xff] %vm15_vm1, %v606_v27  ;;  %623 = vst.msk [vmem:[#allocation2 + $0x18] sm:$0xff] %vm15_vm1, %v607_v28 }
 0x1b8   :  { %v593_v31 = vpop.xlane.xlu0 %592  ;;  %v595_v33 = vpop.xlane.xlu1 %594 }
 0x1b9   :  { %v614_v34 = vadd.f32 %v593_v31, %v550_v29  ;;  %v615_v35 = vadd.f32 %v595_v33, %v551_v30 }
 0x1bb   :  { %630 = vst.msk [vmem:[#allocation2 + $0x50] sm:$0xff] %vm15_vm1, %v614_v34  ;;  %631 = vst.msk [vmem:[#allocation2 + $0x58] sm:$0xff] %vm15_vm1, %v615_v35 }
 0x1bc   :  { %v581_v37 = vpop.xlane.xlu0 %580  ;;  %v583_v38 = vpop.xlane.xlu1 %582 }
 0x1bd   :  { %v608_v39 = vadd.f32 %v581_v37, %v544_v36  ;;  %v609_v40 = vadd.f32 %v583_v38, %v545_v0 }
 0x1bf   :  { %624 = vst.msk [vmem:[#allocation2 + $0x20] sm:$0xff] %vm15_vm1, %v608_v39  ;;  %625 = vst.msk [vmem:[#allocation2 + $0x28] sm:$0xff] %vm15_vm1, %v609_v40 }
 0x1c0   :  { %v1021_v43 = vpop.eup %1020  ;;  %v597_v44 = vpop.xlane.xlu0 %596 }
 0x1c1   :  { %v599_v45 = vpop.xlane.xlu1 %598  ;;  %v688_v46 = vmul.f32 0.6931472, %v1021_v43  ;;  %v616_v47 = vadd.f32 %v597_v44, %v552_v41 }
 0x1c2   :  { %v617_v48 = vadd.f32 %v599_v45, %v553_v42 }
 0x1c3   :  { %v719_v52 = vadd.f32 14.285714, %v688_v46  ;;  %632 = vst.msk [vmem:[#allocation2 + $0x60] sm:$0xff] %vm15_vm1, %v616_v47 }
 0x1c4   :  { %633 = vst.msk [vmem:[#allocation2 + $0x68] sm:$0xff] %vm15_vm1, %v617_v48  ;;  %v585_v54 = vpop.xlane.xlu0 %584 }
 0x1c5   :  { %v587_v53 = vpop.xlane.xlu1 %586  ;;  %v735_v56 = vmul.f32 8.0, %v719_v52  ;;  %v610_v58 = vadd.f32 %v585_v54, %v546_v51 }
 0x1c6   :  { %v611_v57 = vadd.f32 %v587_v53, %v547_v50 }
 0x1c7   :  { %v751_v61 = vsub.f32 %v655_v55, %v735_v56  ;;  %626 = vst.msk [vmem:[#allocation2 + $0x30] sm:$0xff] %vm15_vm1, %v610_v58 }
 0x1c8   :  { %627 = vst.msk [vmem:[#allocation2 + $0x38] sm:$0xff] %vm15_vm1, %v611_v57  ;;  %v601_v1 = vpop.xlane.xlu0 %600 }
 0x1c9   :  { %v603_v62 = vpop.xlane.xlu1 %602  ;;  %799 = vst.msk [vmem:[%s1507_s2] sm:$0xff] %vm15_vm1, %v751_v61  ;;  %v618_v32 = vadd.f32 %v601_v1, %v554_v60 }
 0x1ca   :  { %v619_v2 = vadd.f32 %v603_v62, %v555_v59 }
 0x1cb   :  { %634 = vst.msk [vmem:[#allocation2 + $0x70] sm:$0xff] %vm15_vm1, %v618_v32 }
 0x1cc   :  { %635 = vst.msk [vmem:[#allocation2 + $0x78] sm:$0xff] %vm15_vm1, %v619_v2 }

</bundles_post_ra>
